<compile_context>
chip_gen: v7x
topology: tpu7x:2x2x1
jax: 0.10.0
libtpu: 0.0.40
codegen_flags: <defaults>
</compile_context>

<pallas_src>
import functools

import jax
import jax.numpy as jnp
import numpy as np
from jax.experimental import pallas as pl
from jax.experimental.pallas import tpu as pltpu


# ----------------------------------------------------------------------------
# Pallas kernel
# ----------------------------------------------------------------------------
def _names_to_indices_kernel(vocab_ref, names_ref, out_ref):
    # vocab_ref : (V,) int32 in SMEM (scalar prefetch)
    # names_ref : (TILE_ROWS, 128) int32 query tile in VMEM
    names = names_ref[...]
    v = vocab_ref.shape[0]
    acc0 = jnp.full(names.shape, -1, dtype=jnp.int32)

    def body(k, acc):
        code = vocab_ref[k]                                  # scalar SMEM read
        return jnp.maximum(acc, jnp.where(names == code, k, jnp.int32(-1)))

    # Unrolled scalar-vocab loop: live state is only {names tile, acc} so the
    # VPU compare/select never spills; the scalar slots feed the vocab codes.
    unroll = True if v <= 256 else 8
    out_ref[...] = jax.lax.fori_loop(0, v, body, acc0, unroll=unroll)


@functools.partial(jax.jit, static_argnames=("tile_rows",))
def _lookup_indices(vocab_codes, names_codes, *, tile_rows):
    """vocab_codes: (V,) int32, names_codes: (rows, 128) int32 -> (rows, 128) int32."""
    rows, lanes = names_codes.shape
    # TODO(synk): for vocabularies too large for SMEM (tens of thousands of
    # entries), add a trailing "arbitrary" grid axis over vocab chunks with a
    # VMEM int32 running-max accumulator (pl.when k==0 init / k==last store).
    return pl.pallas_call(
        _names_to_indices_kernel,
        out_shape=jax.ShapeDtypeStruct((rows, lanes), jnp.int32),
        grid_spec=pltpu.PrefetchScalarGridSpec(
            num_scalar_prefetch=1,
            grid=(rows // tile_rows,),
            in_specs=[
                pl.BlockSpec((tile_rows, lanes), lambda i, vocab: (i, 0)),
            ],
            out_specs=pl.BlockSpec((tile_rows, lanes), lambda i, vocab: (i, 0)),
        ),
        compiler_params=pltpu.CompilerParams(
            dimension_semantics=("parallel",),   # independent query tiles
        ),
    )(vocab_codes, names_codes)


# ----------------------------------------------------------------------------
# Host glue: deterministic string -> int32 encoding and ragged-list handling.
# ----------------------------------------------------------------------------
_PAD_QUERY = -1     # query padding; safe because all real codes are >= 0
_PAD_VOCAB = -2     # vocab padding (sparse keys); never equals a query code
_LANES = 128
_MAX_TILE_ROWS = 64   # 64 rows x 128 lanes = 8192 queries per grid step


def _encode_name(name) -> int:
    # Deterministic polynomial hash into the NON-NEGATIVE int32 range.
    h = 0
    for ch in str(name):
        h = (h * 131 + ord(ch)) % 2147483629
    return int(h)


def _pad_and_tile(n_total: int):
    """Pad query count to full (rows, 128) tiles and pick the row tile."""
    rows = max(1, -(-n_total // _LANES))
    rows = -(-rows // 8) * 8                      # sublane-align (>= 8 rows)
    if rows <= _MAX_TILE_ROWS:
        return rows, rows                         # single lane-dense tile
    rows = -(-rows // _MAX_TILE_ROWS) * _MAX_TILE_ROWS
    return rows, _MAX_TILE_ROWS


class NamesToIndicesPallas:
    """JAX/Pallas equivalent of torchoutil NamesToIndices."""

    def __init__(self, idx_to_name):
        self.idx_to_name = dict(idx_to_name)
        max_idx = max(self.idx_to_name.keys())
        codes = np.full((max_idx + 1,), _PAD_VOCAB, dtype=np.int32)
        self._code_cache = {}
        seen = {}
        for i, name in self.idx_to_name.items():    # sparse keys are OK
            c = _encode_name(name)
            assert c >= 0, "name codes must be non-negative (padding sentinels)"
            if c in seen and seen[c] != name:
                raise ValueError(f"name-code collision: {seen[c]!r} vs {name!r}")
            seen[c] = name
            codes[i] = c
            self._code_cache[name] = c
        self.vocab_codes = jnp.asarray(codes)       # (V,) int32, SMEM-prefetched

    def _code(self, name) -> int:
        c = self._code_cache.get(name)
        if c is None:
            c = _encode_name(name)
            self._code_cache[name] = c
        return c

    def __call__(self, names):
        # names: List[List[T]]  ->  List[List[int]]
        lengths = [len(row) for row in names]
        flat = [self._code(n) for row in names for n in row]
        n_total = len(flat)
        if n_total == 0:
            return [[] for _ in lengths]

        rows, tile_rows = _pad_and_tile(n_total)
        buf = np.full((rows * _LANES,), _PAD_QUERY, dtype=np.int32)
        buf[:n_total] = flat
        names_codes = jnp.asarray(buf.reshape(rows, _LANES))

        out = _lookup_indices(self.vocab_codes, names_codes, tile_rows=tile_rows)
        flat_idx = np.asarray(jax.device_get(out)).reshape(-1)[:n_total].tolist()

        # Missing names map to -1 (the torch reference would raise on a dict
        # miss; downstream code must treat -1 as "not found").
        result, pos = [], 0
        for length in lengths:
            result.append(flat_idx[pos:pos + length])
            pos += length
        return result


if __name__ == "__main__":
    # Deterministic "checkpoint": a 10-class name table.
    idx_to_name = {i: f"class_{i}" for i in range(10)}
    module = NamesToIndicesPallas(idx_to_name)

    # Deterministic example input (2 ragged lists of names) from PRNGKey(0).
    key = jax.random.PRNGKey(0)
    k0, k1 = jax.random.split(key)
    row0 = [int(v) for v in jax.random.randint(k0, (5,), 0, 10)]
    row1 = [int(v) for v in jax.random.randint(k1, (3,), 0, 10)]
    names = [[idx_to_name[i] for i in row0], [idx_to_name[i] for i in row1]]

    # Run the kernel once directly and block on the device result.
    flat = [module._code(n) for row in names for n in row]
    rows, tile_rows = _pad_and_tile(len(flat))
    buf = np.full((rows * _LANES,), _PAD_QUERY, dtype=np.int32)
    buf[:len(flat)] = flat
    raw = _lookup_indices(
        module.vocab_codes, jnp.asarray(buf.reshape(rows, _LANES)), tile_rows=tile_rows
    )
    jax.block_until_ready(raw)

    # Full module call + pure-python reference check.
    indices = module(names)
    name_to_idx = {v: k for k, v in idx_to_name.items()}
    expected = [[name_to_idx[n] for n in row] for row in names]
    assert indices == expected, (indices, expected)
    raw_flat = np.asarray(jax.device_get(raw)).reshape(-1)[:len(flat)].tolist()
    assert raw_flat == [i for row in expected for i in row], (raw_flat, expected)

    print("KERNEL_OK")
</pallas_src>

<mosaic_0001>
module attributes {stable_mosaic.version = 11 : i64} {
  func.func @_names_to_indices_kernel(%arg0: i32, %arg1: memref<10xi32, #tpu.memory_space<smem>>, %arg2: memref<8x128xi32, #tpu.memory_space<vmem>>, %arg3: memref<8x128xi32, #tpu.memory_space<vmem>>) attributes {dimension_semantics = [#tpu.dimension_semantics<parallel>], iteration_bounds = array<i64: 1>, scalar_prefetch = 1 : i64, scratch_operands = 0 : i64, tpu.core_type = #tpu.core_type<tc>, window_params = [{transform_indices = @transform_0, window_bounds = array<i64: 8, 128>}, {transform_indices = @transform_1, window_bounds = array<i64: 8, 128>}]} {
    %c0 = arith.constant 0 : index
    %c0_0 = arith.constant 0 : index
    %0 = vector.load %arg2[%c0, %c0_0] : memref<8x128xi32, #tpu.memory_space<vmem>>, vector<8x128xi32>
    %c-1_i32 = arith.constant -1 : i32
    %1 = vector.broadcast %c-1_i32 : i32 to vector<8x128xi32>
    %c0_i32 = arith.constant 0 : i32
    %2 = arith.index_cast %c0_i32 : i32 to index
    %3 = memref.load %arg1[%2] : memref<10xi32, #tpu.memory_space<smem>>
    %4 = vector.broadcast %3 : i32 to vector<8x128xi32>
    %5 = arith.cmpi eq, %0, %4 : vector<8x128xi32>
    %c-1_i32_1 = arith.constant -1 : i32
    %6 = vector.broadcast %c0_i32 : i32 to vector<8x128xi32>
    %7 = vector.broadcast %c-1_i32_1 : i32 to vector<8x128xi32>
    %8 = arith.select %5, %6, %7 : vector<8x128xi1>, vector<8x128xi32>
    %9 = arith.maxsi %1, %8 : vector<8x128xi32>
    %c1_i32 = arith.constant 1 : i32
    %10 = arith.index_cast %c1_i32 : i32 to index
    %11 = memref.load %arg1[%10] : memref<10xi32, #tpu.memory_space<smem>>
    %12 = vector.broadcast %11 : i32 to vector<8x128xi32>
    %13 = arith.cmpi eq, %0, %12 : vector<8x128xi32>
    %c-1_i32_2 = arith.constant -1 : i32
    %14 = vector.broadcast %c1_i32 : i32 to vector<8x128xi32>
    %15 = vector.broadcast %c-1_i32_2 : i32 to vector<8x128xi32>
    %16 = arith.select %13, %14, %15 : vector<8x128xi1>, vector<8x128xi32>
    %17 = arith.maxsi %9, %16 : vector<8x128xi32>
    %c2_i32 = arith.constant 2 : i32
    %18 = arith.index_cast %c2_i32 : i32 to index
    %19 = memref.load %arg1[%18] : memref<10xi32, #tpu.memory_space<smem>>
    %20 = vector.broadcast %19 : i32 to vector<8x128xi32>
    %21 = arith.cmpi eq, %0, %20 : vector<8x128xi32>
    %c-1_i32_3 = arith.constant -1 : i32
    %22 = vector.broadcast %c2_i32 : i32 to vector<8x128xi32>
    %23 = vector.broadcast %c-1_i32_3 : i32 to vector<8x128xi32>
    %24 = arith.select %21, %22, %23 : vector<8x128xi1>, vector<8x128xi32>
    %25 = arith.maxsi %17, %24 : vector<8x128xi32>
    %c3_i32 = arith.constant 3 : i32
    %26 = arith.index_cast %c3_i32 : i32 to index
    %27 = memref.load %arg1[%26] : memref<10xi32, #tpu.memory_space<smem>>
    %28 = vector.broadcast %27 : i32 to vector<8x128xi32>
    %29 = arith.cmpi eq, %0, %28 : vector<8x128xi32>
    %c-1_i32_4 = arith.constant -1 : i32
    %30 = vector.broadcast %c3_i32 : i32 to vector<8x128xi32>
    %31 = vector.broadcast %c-1_i32_4 : i32 to vector<8x128xi32>
    %32 = arith.select %29, %30, %31 : vector<8x128xi1>, vector<8x128xi32>
    %33 = arith.maxsi %25, %32 : vector<8x128xi32>
    %c4_i32 = arith.constant 4 : i32
    %34 = arith.index_cast %c4_i32 : i32 to index
    %35 = memref.load %arg1[%34] : memref<10xi32, #tpu.memory_space<smem>>
    %36 = vector.broadcast %35 : i32 to vector<8x128xi32>
    %37 = arith.cmpi eq, %0, %36 : vector<8x128xi32>
    %c-1_i32_5 = arith.constant -1 : i32
    %38 = vector.broadcast %c4_i32 : i32 to vector<8x128xi32>
    %39 = vector.broadcast %c-1_i32_5 : i32 to vector<8x128xi32>
    %40 = arith.select %37, %38, %39 : vector<8x128xi1>, vector<8x128xi32>
    %41 = arith.maxsi %33, %40 : vector<8x128xi32>
    %c5_i32 = arith.constant 5 : i32
    %42 = arith.index_cast %c5_i32 : i32 to index
    %43 = memref.load %arg1[%42] : memref<10xi32, #tpu.memory_space<smem>>
    %44 = vector.broadcast %43 : i32 to vector<8x128xi32>
    %45 = arith.cmpi eq, %0, %44 : vector<8x128xi32>
    %c-1_i32_6 = arith.constant -1 : i32
    %46 = vector.broadcast %c5_i32 : i32 to vector<8x128xi32>
    %47 = vector.broadcast %c-1_i32_6 : i32 to vector<8x128xi32>
    %48 = arith.select %45, %46, %47 : vector<8x128xi1>, vector<8x128xi32>
    %49 = arith.maxsi %41, %48 : vector<8x128xi32>
    %c6_i32 = arith.constant 6 : i32
    %50 = arith.index_cast %c6_i32 : i32 to index
    %51 = memref.load %arg1[%50] : memref<10xi32, #tpu.memory_space<smem>>
    %52 = vector.broadcast %51 : i32 to vector<8x128xi32>
    %53 = arith.cmpi eq, %0, %52 : vector<8x128xi32>
    %c-1_i32_7 = arith.constant -1 : i32
    %54 = vector.broadcast %c6_i32 : i32 to vector<8x128xi32>
    %55 = vector.broadcast %c-1_i32_7 : i32 to vector<8x128xi32>
    %56 = arith.select %53, %54, %55 : vector<8x128xi1>, vector<8x128xi32>
    %57 = arith.maxsi %49, %56 : vector<8x128xi32>
    %c7_i32 = arith.constant 7 : i32
    %58 = arith.index_cast %c7_i32 : i32 to index
    %59 = memref.load %arg1[%58] : memref<10xi32, #tpu.memory_space<smem>>
    %60 = vector.broadcast %59 : i32 to vector<8x128xi32>
    %61 = arith.cmpi eq, %0, %60 : vector<8x128xi32>
    %c-1_i32_8 = arith.constant -1 : i32
    %62 = vector.broadcast %c7_i32 : i32 to vector<8x128xi32>
    %63 = vector.broadcast %c-1_i32_8 : i32 to vector<8x128xi32>
    %64 = arith.select %61, %62, %63 : vector<8x128xi1>, vector<8x128xi32>
    %65 = arith.maxsi %57, %64 : vector<8x128xi32>
    %c8_i32 = arith.constant 8 : i32
    %66 = arith.index_cast %c8_i32 : i32 to index
    %67 = memref.load %arg1[%66] : memref<10xi32, #tpu.memory_space<smem>>
    %68 = vector.broadcast %67 : i32 to vector<8x128xi32>
    %69 = arith.cmpi eq, %0, %68 : vector<8x128xi32>
    %c-1_i32_9 = arith.constant -1 : i32
    %70 = vector.broadcast %c8_i32 : i32 to vector<8x128xi32>
    %71 = vector.broadcast %c-1_i32_9 : i32 to vector<8x128xi32>
    %72 = arith.select %69, %70, %71 : vector<8x128xi1>, vector<8x128xi32>
    %73 = arith.maxsi %65, %72 : vector<8x128xi32>
    %c9_i32 = arith.constant 9 : i32
    %74 = arith.index_cast %c9_i32 : i32 to index
    %75 = memref.load %arg1[%74] : memref<10xi32, #tpu.memory_space<smem>>
    %76 = vector.broadcast %75 : i32 to vector<8x128xi32>
    %77 = arith.cmpi eq, %0, %76 : vector<8x128xi32>
    %c-1_i32_10 = arith.constant -1 : i32
    %78 = vector.broadcast %c9_i32 : i32 to vector<8x128xi32>
    %79 = vector.broadcast %c-1_i32_10 : i32 to vector<8x128xi32>
    %80 = arith.select %77, %78, %79 : vector<8x128xi1>, vector<8x128xi32>
    %81 = arith.maxsi %73, %80 : vector<8x128xi32>
    %c10_i32 = arith.constant 10 : i32
    %c0_11 = arith.constant 0 : index
    %c0_12 = arith.constant 0 : index
    %82 = vector.load %arg3[%c0_11, %c0_12] : memref<8x128xi32, #tpu.memory_space<vmem>>, vector<8x128xi32>
    tpu.vector_store %arg3[%c0_11, %c0_12], %81 {strides = array<i32>} : memref<8x128xi32, #tpu.memory_space<vmem>>, vector<8x128xi32>,
    return
  }
  func.func @transform_0(%arg0: i32, %arg1: memref<10xi32, #tpu.memory_space<smem>>) -> (i32, i32) {
    %c0_i32 = arith.constant 0 : i32
    %c0_i32_0 = arith.constant 0 : i32
    return %arg0, %c0_i32 : i32, i32
  }
  func.func @transform_1(%arg0: i32, %arg1: memref<10xi32, #tpu.memory_space<smem>>) -> (i32, i32) {
    %c0_i32 = arith.constant 0 : i32
    %c0_i32_0 = arith.constant 0 : i32
    return %arg0, %c0_i32 : i32, i32
  }
}

</mosaic_0001>

<bundles_post_ra>
// kernel: _lookup_indices.1
= control target key start
LH: loop header
LB: loop body
LE: loop exit
PB: predicated region body
PF: predicated region fallthrough
CT: control target
= control target key end

     0   :  { %s239_s0 = inlined_call_operand.hbm [shape: s32[10], index: 0, kind: input, shape index: {}]   ;;  %s240_s1 = inlined_call_operand.hbm [shape: s32[8,128], index: 1, kind: input, shape index: {}]   ;;  %s241_s2 = inlined_call_operand.hbm [shape: s32[8,128], index: 2, kind: output, shape index: {}]  }
   0x1   :  { %s115_s11 = scalar_lea.hbm %s239_s0, 16 }
   0x2   :  { %p116_p0 = scmp.ne.s32.totalorder %s239_s0, %s115_s11  ;;  %p119_p1 = scmp.lt.u32.totalorder %s115_s11, %s239_s0 }
   0x4   :  { %p121_p2 = pnand %p119_p1, %p116_p0 }
   0x6   :  { %124 = shalt.err (!%p121_p2)  }
   0x7   :  { %s175_s16 = smov [#allocation3]  }
   0x8   :  { %8 = dma.hbm_to_smem %s239_s0, 16, %s175_s16, [#allocation2] }
   0x9   :  { %169 = dma.done.wait [#allocation2], 16 }
   0xa   :  { %170 = vsyncadd [#allocation2], 4294967280 }
   0xb   :  { %10 = sfence }
   0xc   :  { %11 = vsyncpa [#allocation5], 0 }
   0xd   :  { %12 = vsyncpa [#allocation6], 0  ;;  %s176_s19 = smov [#allocation4]   ;;  %s125_s23 = scalar_lea.hbm %s240_s1, 128 }
   0xe   :  { %s19_s20 = sshll.u32 %s176_s19, 4  ;;  %p126_p3 = scmp.ne.s32.totalorder %s240_s1, %s125_s23  ;;  %s20_s20 = int_to_ptr.vmem [resolvable:$true] %s19_s20 }
   0xf   :  { %p129_p4 = scmp.lt.u32.totalorder %s125_s23, %s240_s1 }
  0x11   :  { %p131_p5 = pnand %p129_p4, %p126_p3 }
  0x13   :  { %134 = shalt.err (!%p131_p5)
}
  0x14   :  { %s135_s0 = scalar_lea.vmem %s20_s20, 128  ;;  %p140_p7 = scmp.lt.s32.totalorder %s20_s20, %s20_s20 }
  0x15   :  { %p136_p6 = scmp.ne.s32.totalorder %s20_s20, %s135_s0  ;;  %p141_p8 = scmp.lt.s32.totalorder %s135_s0, %s135_s0 }
  0x17   :  { %p142_p9 = por %p141_p8, %p140_p7 }
  0x19   :  { %p143_p10 = pnand %p142_p9, %p136_p6 }
  0x1b   :  { %146 = shalt.err (!%p143_p10)
}
  0x1c   :  { %22 = dma.hbm_to_vmem [thread:$0]  %s240_s1, 128, %s20_s20, [#allocation5]  }
  0x1d   :  { %171 = dma.done.wait [#allocation5], 128  }
  0x1e   :  { %172 = vsyncadd [#allocation5], 4294967168  ;;  %s27_s30 = sld [smem:[#allocation3]]  ;;  %s102_s3 = sld [smem:[#allocation3 + $0x1]]  ;;  %v26_v0 = vld [vmem:[#allocation4] sm:$0xff]  ;;  %v177_v5 = vmov 4294967295  }
  0x1f   :  { %s103_s4 = sld [smem:[#allocation3 + $0x2]]  ;;  %s104_s5 = sld [smem:[#allocation3 + $0x3]] }
  0x20   :  { %s105_s6 = sld [smem:[#allocation3 + $0x4]]  ;;  %s106_s7 = sld [smem:[#allocation3 + $0x5]] }
  0x21   :  { %s218_s8 = sld [smem:[#allocation3 + $0x6]]  ;;  %s220_s9 = sld [smem:[#allocation3 + $0x7]] }
  0x22   :  { %s222_s1 = sld [smem:[#allocation3 + $0x8]]  ;;  %s110_s10 = sld [smem:[#allocation3 + $0x9]] }
  0x23   :  { %s178_s11 = smov [#allocation7]  }
  0x24   :  { %v28_v1 = vstv %s27_s30  ;;  %v33_v2 = vstv %s102_s3  ;;  %s93_s12 = sshll.u32 %s178_s11, 4  ;;  %s94_s12 = int_to_ptr.vmem [resolvable:$true] %s93_s12 }
  0x25   :  { %vm29_vm0 = vcmp.eq.s32.totalorder %v26_v0, %v28_v1  ;;  %vm34_vm1 = vcmp.eq.s32.totalorder %v26_v0, %v33_v2  ;;  %v39_v3 = vstv %s103_s4  ;;  %v45_v4 = vstv %s104_s5  ;;  %s147_s13 = scalar_lea.vmem %s94_s12, 128  ;;  %p152_p12 = scmp.lt.s32.totalorder %s94_s12, %s94_s12 }
  0x26   :  { %v30_v6 = vsel %vm29_vm0, 0, %v177_v5  ;;  %v35_v7 = vsel %vm34_vm1, 1, %v177_v5  ;;  %vm40_vm2 = vcmp.eq.s32.totalorder %v26_v0, %v39_v3  ;;  %vm46_vm3 = vcmp.eq.s32.totalorder %v26_v0, %v45_v4  ;;  %p148_p11 = scmp.ne.s32.totalorder %s94_s12, %s147_s13  ;;  %p153_p13 = scmp.lt.s32.totalorder %s147_s13, %s147_s13 }
  0x27   :  { %v31_v8 = vsel %vm29_vm0, %v30_v6, 4294967295  ;;  %v41_v9 = vsel %vm40_vm2, 2, %v177_v5  ;;  %v51_v10 = vstv %s105_s6  ;;  %v57_v11 = vstv %s106_s7 }
  0x28   :  { %vm36_vm4 = vcmp.gt.s32.totalorder %v31_v8, %v35_v7  ;;  %vm52_vm5 = vcmp.eq.s32.totalorder %v26_v0, %v51_v10  ;;  %v47_v13 = vsel %vm46_vm3, 3, %v177_v5  ;;  %v63_v14 = vstv %s218_s8  ;;  %p154_p0 = por %p153_p13, %p152_p12 }
  0x29   :  { %v37_v12 = vsel %vm36_vm4, %v31_v8, %v35_v7  ;;  %vm58_vm7 = vcmp.eq.s32.totalorder %v26_v0, %v57_v11  ;;  %v53_v16 = vsel %vm52_vm5, 4, %v177_v5  ;;  %v69_v17 = vstv %s220_s9 }
  0x2a   :  { %vm42_vm6 = vcmp.gt.s32.totalorder %v37_v12, %v41_v9  ;;  %vm64_vm9 = vcmp.eq.s32.totalorder %v26_v0, %v63_v14  ;;  %v59_v19 = vsel %vm58_vm7, 5, %v177_v5  ;;  %v75_v20 = vstv %s222_s1  ;;  %p155_p1 = pnand %p154_p0, %p148_p11 }
  0x2b   :  { %v43_v15 = vsel %vm42_vm6, %v37_v12, %v41_v9  ;;  %vm70_vm11 = vcmp.eq.s32.totalorder %v26_v0, %v69_v17  ;;  %v65_v22 = vsel %vm64_vm9, 6, %v177_v5  ;;  %v81_v23 = vstv %s110_s10 }
  0x2c   :  { %vm48_vm8 = vcmp.gt.s32.totalorder %v43_v15, %v47_v13  ;;  %vm76_vm13 = vcmp.eq.s32.totalorder %v26_v0, %v75_v20  ;;  %v71_v25 = vsel %vm70_vm11, 7, %v177_v5  ;;  %vm82_vm15 = vcmp.eq.s32.totalorder %v26_v0, %v81_v23 }
  0x2d   :  { %v49_v18 = vsel %vm48_vm8, %v43_v15, %v47_v13  ;;  %v77_v27 = vsel %vm76_vm13, 8, %v177_v5  ;;  %v83_v29 = vsel %vm82_vm15, 9, %v177_v5 }
  0x2e   :  { %vm54_vm10 = vcmp.gt.s32.totalorder %v49_v18, %v53_v16 }
  0x2f   :  { %v55_v21 = vsel %vm54_vm10, %v49_v18, %v53_v16 }
  0x30   :  { %vm60_vm12 = vcmp.gt.s32.totalorder %v55_v21, %v59_v19 }
  0x31   :  { %v61_v24 = vsel %vm60_vm12, %v55_v21, %v59_v19 }
  0x32   :  { %vm66_vm14 = vcmp.gt.s32.totalorder %v61_v24, %v65_v22 }
  0x33   :  { %v67_v26 = vsel %vm66_vm14, %v61_v24, %v65_v22 }
  0x34   :  { %vm72_vm0 = vcmp.gt.s32.totalorder %v67_v26, %v71_v25 }
  0x35   :  { %v73_v28 = vsel %vm72_vm0, %v67_v26, %v71_v25 }
  0x36   :  { %vm78_vm1 = vcmp.gt.s32.totalorder %v73_v28, %v77_v27 }
  0x37   :  { %v79_v30 = vsel %vm78_vm1, %v73_v28, %v77_v27 }
  0x38   :  { %vm84_vm2 = vcmp.gt.s32.totalorder %v79_v30, %v83_v29 }
  0x39   :  { %v85_v31 = vsel %vm84_vm2, %v79_v30, %v83_v29 }
  0x3a   :  { %86 = vst [vmem:[#allocation7] sm:$0xff] %v85_v31 }
  0x3b   :  { %158 = shalt.err (!%p155_p1)
}
  0x3c   :  { %s159_s16 = scalar_lea.hbm %s241_s2, 128 }
  0x3d   :  { %p160_p2 = scmp.ne.s32.totalorder %s241_s2, %s159_s16  ;;  %p163_p3 = scmp.lt.u32.totalorder %s159_s16, %s241_s2 }
  0x3f   :  { %p165_p4 = pnand %p163_p3, %p160_p2 }
  0x41   :  { %168 = shalt.err (!%p165_p4)
}
  0x42   :  { %96 = dma.vmem_to_hbm [thread:$0]  %s94_s12, 128, %s241_s2, [#allocation6]  }
  0x43   :  { %173 = dma.done.wait [#allocation6], 128  }
  0x44   :  { %174 = vsyncadd [#allocation6], 4294967168 }
  0x45   :  { %100 = vsyncpa [#allocation5], 1 }
  0x46   :  { %101 = vsyncpa [#allocation6], 1 }

</bundles_post_ra>
